<compile_context>
chip_gen: v7x
topology: tpu7x:2x2x1
jax: 0.10.0
libtpu: 0.0.40
codegen_flags: <defaults>
</compile_context>

<pallas_src>
import functools

import jax
import jax.numpy as jnp
from jax import lax
from jax.experimental import pallas as pl
from jax.experimental.pallas import tpu as pltpu


def _round_up(x, m):
    return (x + m - 1) // m * m


def _focal_sum_kernel(logits_ref, labels_ref, out_ref, acc_loss, acc_gsum, *,
                      alpha, gamma, tm, n_rows, n_blocks, steps_per_group,
                      needs_tail_mask, has_duplicate_blocks):
    g = pl.program_id(0)
    s = pl.program_id(1)
    block_idx = g * steps_per_group + s

    @pl.when(s == 0)
    def _():
        acc_loss[...] = jnp.zeros_like(acc_loss)
        acc_gsum[...] = jnp.zeros_like(acc_gsum)

    def accumulate():
        x = logits_ref[...].astype(jnp.float32)
        t = labels_ref[...].astype(jnp.float32)

        # One shared exp(-|x|) feeds both the sigmoid and the stable BCE.
        e = jnp.exp(-jnp.abs(x))                           # EUP: exp
        p = jnp.where(x >= 0.0, 1.0, e) / (1.0 + e)        # == sigmoid(x)
        ce = jnp.maximum(x, 0.0) - x * t + jnp.log1p(e)    # EUP: log1p
        # 1 - p_t  ==  p + t - 2*p*t   (exact for 0/1 labels)
        w = p + t - 2.0 * (p * t)

        # (1 - p_t) ** gamma; small integer gamma avoids pow() (= exp + log).
        gf = float(gamma)
        if gf == int(gf) and 0.0 <= gf <= 6.0:
            wg = jnp.ones_like(w)
            for _ in range(int(gf)):
                wg = wg * w
        else:
            wg = jnp.power(w, gamma)
        loss = ce * wg

        if alpha >= 0:
            # alpha*t + (1-alpha)*(1-t)  ==  (1-alpha) + (2*alpha - 1)*t
            loss = ((1.0 - alpha) + (2.0 * alpha - 1.0) * t) * loss

        if needs_tail_mask:
            # Zero contributions from rows past N in the ragged tail block.
            row = (block_idx * tm
                   + lax.broadcasted_iota(jnp.int32, (tm, 1), 0))
            valid = row < n_rows
            loss = jnp.where(valid, loss, 0.0)
            t = jnp.where(valid, t, 0.0)

        # vreg-shaped accumulation: fold sublane groups with pure VPU adds;
        # the expensive cross-lane reduce happens once, in the wrapper.
        c = loss.shape[-1]
        acc_loss[...] += loss.reshape(tm // 8, 8, c).sum(axis=0)
        acc_gsum[...] += t.reshape(tm // 8, 8, c).sum(axis=0)

    if has_duplicate_blocks:
        # Clamped duplicate blocks are skipped entirely (no compute at all);
        # their DMA re-reads the last real block, which is harmless.
        pl.when(block_idx < n_blocks)(accumulate)
    else:
        accumulate()

    @pl.when(s == steps_per_group - 1)
    def _():
        out_ref[0, 0] = acc_loss[...]
        out_ref[0, 1] = acc_gsum[...]


def node_cls_loss(pred_logits, gt_labels, *, focal_alpha=0.25,
                  focal_gamma=2.0, tm=None,
                  vmem_budget_bytes=16 * 1024 * 1024,
                  num_parallel_groups=2):
    """Forward pass of NodeClsLoss. pred_logits/gt_labels: (N, C)."""
    N, C = pred_logits.shape
    assert gt_labels.shape == (N, C)

    if tm is None:
        # 2 pipeline buffers per input stream must fit the VMEM budget.
        per_row = 2 * (pred_logits.dtype.itemsize
                       + gt_labels.dtype.itemsize) * C
        tm = min(2048, vmem_budget_bytes // max(per_row, 1))
    tm = int(min(max(tm, 8), _round_up(N, 8)))
    tm = (tm // 8) * 8

    nb = pl.cdiv(N, tm)                                  # row blocks
    G = num_parallel_groups if nb >= num_parallel_groups else 1
    S = pl.cdiv(nb, G)                                   # serial steps/group
    needs_tail_mask = (nb * tm != N)
    has_duplicate_blocks = (G * S != nb)

    if has_duplicate_blocks:
        # Clamp the block index for the padded tail of the last group; the
        # kernel skips those iterations, so re-reading a block is harmless.
        def in_map(gi, si):
            return (jnp.minimum(gi * S + si, nb - 1), 0)
    else:
        def in_map(gi, si):
            return (gi * S + si, 0)

    kernel = functools.partial(
        _focal_sum_kernel, alpha=float(focal_alpha), gamma=float(focal_gamma),
        tm=tm, n_rows=N, n_blocks=nb, steps_per_group=S,
        needs_tail_mask=needs_tail_mask,
        has_duplicate_blocks=has_duplicate_blocks)

    slab = pl.pallas_call(
        kernel,
        out_shape=jax.ShapeDtypeStruct((G, 2, 8, C), jnp.float32),
        grid_spec=pltpu.PrefetchScalarGridSpec(
            num_scalar_prefetch=0,
            grid=(G, S),
            in_specs=[pl.BlockSpec((tm, C), in_map),
                      pl.BlockSpec((tm, C), in_map)],
            out_specs=pl.BlockSpec((1, 2, 8, C),
                                   lambda gi, si: (gi, 0, 0, 0)),
            scratch_shapes=[pltpu.VMEM((8, C), jnp.float32),
                            pltpu.VMEM((8, C), jnp.float32)]),
        compiler_params=pltpu.CompilerParams(
            dimension_semantics=("parallel", "arbitrary"),
            vmem_limit_bytes=32 * 1024 * 1024),
    )(pred_logits, gt_labels)

    loss_sum = slab[:, 0].sum()
    gt_sum = slab[:, 1].sum()

    denom = jnp.maximum(1.0, gt_sum)
    normalized = loss_sum / denom / denom    # the module divides twice
    return jnp.where(jnp.isnan(loss_sum), 0.0,
                     jnp.where(gt_sum == 0.0, 0.0, normalized))


def _reference(pred_logits, gt_labels, alpha=0.25, gamma=2.0):
    x = pred_logits.astype(jnp.float32)
    t = gt_labels.astype(jnp.float32)
    p = jax.nn.sigmoid(x)
    ce = jnp.maximum(x, 0.0) - x * t + jnp.log1p(jnp.exp(-jnp.abs(x)))
    p_t = p * t + (1.0 - p) * (1.0 - t)
    loss = ce * (1.0 - p_t) ** gamma
    if alpha >= 0:
        loss = (alpha * t + (1.0 - alpha) * (1.0 - t)) * loss
    loss = loss.sum()
    s = t.sum()
    d = jnp.maximum(1.0, s)
    out = loss / d / d
    return jnp.where(jnp.isnan(loss), 0.0, jnp.where(s == 0.0, 0.0, out))


if __name__ == "__main__":
    # "cfg" parameters (deterministic, no checkpoint):
    FOCAL_ALPHA = 0.25
    FOCAL_GAMMA = 2.0

    key = jax.random.PRNGKey(0)
    k1, k2, k3, k4 = jax.random.split(key, 4)

    # Case 1: nominal small shape -- 16 nodes, 128 classes.
    N, C = 16, 128
    pred_logits = jax.random.normal(k1, (N, C), dtype=jnp.float32)
    # Labels are 0/1, so bf16 is exact and halves the label HBM stream.
    gt_labels = (jax.random.uniform(k2, (N, C)) < 0.1).astype(jnp.bfloat16)

    out = node_cls_loss(pred_logits, gt_labels,
                        focal_alpha=FOCAL_ALPHA, focal_gamma=FOCAL_GAMMA)
    out = jax.block_until_ready(out)
    ref = _reference(pred_logits, gt_labels, FOCAL_ALPHA, FOCAL_GAMMA)
    assert jnp.allclose(out, ref, rtol=1e-5, atol=1e-6), (out, ref)

    # Case 2: ragged N with a multi-block grid (exercises tail masking, the
    # "parallel" group axis and the skipped duplicate-block path).
    N2, C2 = 40, 128
    logits2 = jax.random.normal(k3, (N2, C2), dtype=jnp.float32)
    labels2 = (jax.random.uniform(k4, (N2, C2)) < 0.05).astype(jnp.bfloat16)
    out2 = jax.block_until_ready(
        node_cls_loss(logits2, labels2, focal_alpha=FOCAL_ALPHA,
                      focal_gamma=FOCAL_GAMMA, tm=16))
    ref2 = _reference(logits2, labels2, FOCAL_ALPHA, FOCAL_GAMMA)
    assert jnp.allclose(out2, ref2, rtol=1e-5, atol=1e-6), (out2, ref2)

    # Case 3: empty ground truth -> exactly 0.
    out3 = jax.block_until_ready(
        node_cls_loss(logits2, jnp.zeros_like(labels2),
                      focal_alpha=FOCAL_ALPHA, focal_gamma=FOCAL_GAMMA,
                      tm=16))
    assert out3 == 0.0, out3

    print("KERNEL_OK")
</pallas_src>

<mosaic_0001>
module attributes {stable_mosaic.version = 11 : i64} {
  func.func @_focal_sum_kernel(%arg0: i32, %arg1: i32, %arg2: memref<16x128xf32, #tpu.memory_space<vmem>>, %arg3: memref<16x128xbf16, #tpu.memory_space<vmem>>, %arg4: memref<1x2x8x128xf32, #tpu.memory_space<vmem>>, %arg5: memref<8x128xf32, #tpu.memory_space<vmem>>, %arg6: memref<8x128xf32, #tpu.memory_space<vmem>>) attributes {dimension_semantics = [#tpu.dimension_semantics<parallel>, #tpu.dimension_semantics<arbitrary>], iteration_bounds = array<i64: 1, 1>, scalar_prefetch = 0 : i64, scratch_operands = 2 : i64, tpu.core_type = #tpu.core_type<tc>, window_params = [{transform_indices = @transform_0, window_bounds = array<i64: 16, 128>}, {transform_indices = @transform_1, window_bounds = array<i64: 16, 128>}, {transform_indices = @transform_2, window_bounds = array<i64: 1, 2, 8, 128>}]} {
    %c0_i32 = arith.constant 0 : i32
    %0 = arith.cmpi eq, %arg1, %c0_i32 : i32
    %1 = arith.extui %0 : i1 to i32
    %c0_i32_0 = arith.constant 0 : i32
    %2 = arith.cmpi ne, %1, %c0_i32_0 : i32
    scf.if %2 {
      %cst_24 = arith.constant 0.000000e+00 : f32
      %50 = vector.broadcast %cst_24 : f32 to vector<8x128xf32>
      %c0_25 = arith.constant 0 : index
      %c0_26 = arith.constant 0 : index
      %51 = vector.load %arg5[%c0_25, %c0_26] : memref<8x128xf32, #tpu.memory_space<vmem>>, vector<8x128xf32>
      tpu.vector_store %arg5[%c0_25, %c0_26], %50 {strides = array<i32>} : memref<8x128xf32, #tpu.memory_space<vmem>>, vector<8x128xf32>,
      %cst_27 = arith.constant 0.000000e+00 : f32
      %52 = vector.broadcast %cst_27 : f32 to vector<8x128xf32>
      %c0_28 = arith.constant 0 : index
      %c0_29 = arith.constant 0 : index
      %53 = vector.load %arg6[%c0_28, %c0_29] : memref<8x128xf32, #tpu.memory_space<vmem>>, vector<8x128xf32>
      tpu.vector_store %arg6[%c0_28, %c0_29], %52 {strides = array<i32>} : memref<8x128xf32, #tpu.memory_space<vmem>>, vector<8x128xf32>,
    } else {
    }
    %c0 = arith.constant 0 : index
    %c0_1 = arith.constant 0 : index
    %3 = vector.load %arg2[%c0, %c0_1] : memref<16x128xf32, #tpu.memory_space<vmem>>, vector<16x128xf32>
    %c0_2 = arith.constant 0 : index
    %c0_3 = arith.constant 0 : index
    %4 = vector.load %arg3[%c0_2, %c0_3] : memref<16x128xbf16, #tpu.memory_space<vmem>>, vector<16x128xbf16>
    %5 = arith.extf %4 : vector<16x128xbf16> to vector<16x128xf32>
    %6 = math.absf %3 : vector<16x128xf32>
    %cst = arith.constant 0.000000e+00 : f32
    %7 = vector.broadcast %cst : f32 to vector<16x128xf32>
    %8 = arith.subf %7, %6 : vector<16x128xf32>
    %9 = math.exp %8 : vector<16x128xf32>
    %cst_4 = arith.constant 0.000000e+00 : f32
    %10 = vector.broadcast %cst_4 : f32 to vector<16x128xf32>
    %11 = arith.cmpf oge, %3, %10 : vector<16x128xf32>
    %cst_5 = arith.constant 1.000000e+00 : f32
    %12 = vector.broadcast %cst_5 : f32 to vector<16x128xf32>
    %13 = arith.select %11, %12, %9 : vector<16x128xi1>, vector<16x128xf32>
    %cst_6 = arith.constant 1.000000e+00 : f32
    %14 = vector.broadcast %cst_6 : f32 to vector<16x128xf32>
    %15 = arith.addf %14, %9 : vector<16x128xf32>
    %16 = arith.divf %13, %15 : vector<16x128xf32>
    %cst_7 = arith.constant 0.000000e+00 : f32
    %17 = vector.broadcast %cst_7 : f32 to vector<16x128xf32>
    %18 = arith.maximumf %3, %17 : vector<16x128xf32>
    %19 = arith.mulf %3, %5 : vector<16x128xf32>
    %20 = arith.subf %18, %19 : vector<16x128xf32>
    %21 = math.log1p %9 : vector<16x128xf32>
    %22 = arith.addf %20, %21 : vector<16x128xf32>
    %23 = arith.addf %16, %5 : vector<16x128xf32>
    %24 = arith.mulf %16, %5 : vector<16x128xf32>
    %cst_8 = arith.constant 2.000000e+00 : f32
    %25 = vector.broadcast %cst_8 : f32 to vector<16x128xf32>
    %26 = arith.mulf %25, %24 : vector<16x128xf32>
    %27 = arith.subf %23, %26 : vector<16x128xf32>
    %cst_9 = arith.constant 1.000000e+00 : f32
    %28 = vector.broadcast %cst_9 : f32 to vector<16x128xf32>
    %29 = arith.mulf %28, %27 : vector<16x128xf32>
    %30 = arith.mulf %29, %27 : vector<16x128xf32>
    %31 = arith.mulf %22, %30 : vector<16x128xf32>
    %cst_10 = arith.constant -5.000000e-01 : f32
    %32 = vector.broadcast %cst_10 : f32 to vector<16x128xf32>
    %33 = arith.mulf %32, %5 : vector<16x128xf32>
    %cst_11 = arith.constant 7.500000e-01 : f32
    %34 = vector.broadcast %cst_11 : f32 to vector<16x128xf32>
    %35 = arith.addf %34, %33 : vector<16x128xf32>
    %36 = arith.mulf %35, %31 : vector<16x128xf32>
    %c0_12 = arith.constant 0 : index
    %c0_13 = arith.constant 0 : index
    %37 = vector.load %arg5[%c0_12, %c0_13] : memref<8x128xf32, #tpu.memory_space<vmem>>, vector<8x128xf32>
    %38 = vector.shape_cast %36 : vector<16x128xf32> to vector<2x8x128xf32>
    %cst_14 = arith.constant dense<0.000000e+00> : vector<8x128xf32>
    %39 = vector.multi_reduction <add>, %38, %cst_14 [0] : vector<2x8x128xf32> to vector<8x128xf32>
    %40 = arith.addf %37, %39 : vector<8x128xf32>
    %c0_15 = arith.constant 0 : index
    %c0_16 = arith.constant 0 : index
    %41 = vector.load %arg5[%c0_15, %c0_16] : memref<8x128xf32, #tpu.memory_space<vmem>>, vector<8x128xf32>
    tpu.vector_store %arg5[%c0_15, %c0_16], %40 {strides = array<i32>} : memref<8x128xf32, #tpu.memory_space<vmem>>, vector<8x128xf32>,
    %c0_17 = arith.constant 0 : index
    %c0_18 = arith.constant 0 : index
    %42 = vector.load %arg6[%c0_17, %c0_18] : memref<8x128xf32, #tpu.memory_space<vmem>>, vector<8x128xf32>
    %43 = vector.shape_cast %5 : vector<16x128xf32> to vector<2x8x128xf32>
    %cst_19 = arith.constant dense<0.000000e+00> : vector<8x128xf32>
    %44 = vector.multi_reduction <add>, %43, %cst_19 [0] : vector<2x8x128xf32> to vector<8x128xf32>
    %45 = arith.addf %42, %44 : vector<8x128xf32>
    %c0_20 = arith.constant 0 : index
    %c0_21 = arith.constant 0 : index
    %46 = vector.load %arg6[%c0_20, %c0_21] : memref<8x128xf32, #tpu.memory_space<vmem>>, vector<8x128xf32>
    tpu.vector_store %arg6[%c0_20, %c0_21], %45 {strides = array<i32>} : memref<8x128xf32, #tpu.memory_space<vmem>>, vector<8x128xf32>,
    %c0_i32_22 = arith.constant 0 : i32
    %47 = arith.cmpi eq, %arg1, %c0_i32_22 : i32
    %48 = arith.extui %47 : i1 to i32
    %c0_i32_23 = arith.constant 0 : i32
    %49 = arith.cmpi ne, %48, %c0_i32_23 : i32
    scf.if %49 {
      %c0_24 = arith.constant 0 : index
      %c0_25 = arith.constant 0 : index
      %50 = vector.load %arg5[%c0_24, %c0_25] : memref<8x128xf32, #tpu.memory_space<vmem>>, vector<8x128xf32>
      %c0_26 = arith.constant 0 : index
      %c0_27 = arith.constant 0 : index
      %c0_28 = arith.constant 0 : index
      %c0_29 = arith.constant 0 : index
      %51 = vector.load %arg4[%c0_26, %c0_27, %c0_28, %c0_29] : memref<1x2x8x128xf32, #tpu.memory_space<vmem>>, vector<1x1x8x128xf32>
      %52 = vector.shape_cast %51 : vector<1x1x8x128xf32> to vector<8x128xf32>
      %53 = vector.shape_cast %50 : vector<8x128xf32> to vector<1x1x8x128xf32>
      tpu.vector_store %arg4[%c0_26, %c0_27, %c0_28, %c0_29], %53 {strides = array<i32>} : memref<1x2x8x128xf32, #tpu.memory_space<vmem>>, vector<1x1x8x128xf32>,
      %c0_30 = arith.constant 0 : index
      %c0_31 = arith.constant 0 : index
      %54 = vector.load %arg6[%c0_30, %c0_31] : memref<8x128xf32, #tpu.memory_space<vmem>>, vector<8x128xf32>
      %c0_32 = arith.constant 0 : index
      %c1 = arith.constant 1 : index
      %c0_33 = arith.constant 0 : index
      %c0_34 = arith.constant 0 : index
      %55 = vector.load %arg4[%c0_32, %c1, %c0_33, %c0_34] : memref<1x2x8x128xf32, #tpu.memory_space<vmem>>, vector<1x1x8x128xf32>
      %56 = vector.shape_cast %55 : vector<1x1x8x128xf32> to vector<8x128xf32>
      %57 = vector.shape_cast %54 : vector<8x128xf32> to vector<1x1x8x128xf32>
      tpu.vector_store %arg4[%c0_32, %c1, %c0_33, %c0_34], %57 {strides = array<i32>} : memref<1x2x8x128xf32, #tpu.memory_space<vmem>>, vector<1x1x8x128xf32>,
    } else {
    }
    return
  }
  func.func @transform_0(%arg0: i32, %arg1: i32) -> (i32, i32) {
    %c1_i32 = arith.constant 1 : i32
    %0 = arith.muli %arg0, %c1_i32 : i32
    %1 = arith.addi %0, %arg1 : i32
    %c0_i32 = arith.constant 0 : i32
    %c0_i32_0 = arith.constant 0 : i32
    return %1, %c0_i32 : i32, i32
  }
  func.func @transform_1(%arg0: i32, %arg1: i32) -> (i32, i32) {
    %c1_i32 = arith.constant 1 : i32
    %0 = arith.muli %arg0, %c1_i32 : i32
    %1 = arith.addi %0, %arg1 : i32
    %c0_i32 = arith.constant 0 : i32
    %c0_i32_0 = arith.constant 0 : i32
    return %1, %c0_i32 : i32, i32
  }
  func.func @transform_2(%arg0: i32, %arg1: i32) -> (i32, i32, i32, i32) {
    %c0_i32 = arith.constant 0 : i32
    %c0_i32_0 = arith.constant 0 : i32
    %c0_i32_1 = arith.constant 0 : i32
    %c0_i32_2 = arith.constant 0 : i32
    return %arg0, %c0_i32, %c0_i32_0, %c0_i32_1 : i32, i32, i32, i32
  }
}

</mosaic_0001>

<bundles_post_ra>
// kernel: tpu_custom_call.1
= control target key start
LH: loop header
LB: loop body
LE: loop exit
PB: predicated region body
PF: predicated region fallthrough
CT: control target
= control target key end

     0   :  { %7 = vsyncpa [#allocation5], 0  ;;  %s325_s0 = inlined_call_operand.hbm [shape: f32[16,128], index: 0, kind: input, shape index: {}]   ;;  %s326_s1 = inlined_call_operand.hbm [shape: bf16[16,128], index: 1, kind: input, shape index: {}]   ;;  %s327_s2 = inlined_call_operand.hbm [shape: f32[1,2,8,128], index: 2, kind: output, shape index: {}]  }
   0x1   :  { %8 = vsyncpa [#allocation8], 0 }
   0x2   :  { %9 = vsyncpa [#allocation6], 0  ;;  %s255_s9 = smov [#allocation4]   ;;  %s183_s13 = scalar_lea.hbm %s325_s0, 256 }
   0x3   :  { %s19_s10 = sshll.u32 %s255_s9, 4  ;;  %p184_p0 = scmp.ne.s32.totalorder %s325_s0, %s183_s13  ;;  %s20_s10 = int_to_ptr.vmem [resolvable:$true] %s19_s10 }
   0x4   :  { %p187_p1 = scmp.lt.u32.totalorder %s183_s13, %s325_s0 }
   0x6   :  { %p189_p2 = pnand %p187_p1, %p184_p0 }
   0x8   :  { %192 = shalt.err (!%p189_p2)
}
   0x9   :  { %s193_s18 = scalar_lea.vmem %s20_s10, 256  ;;  %p198_p4 = scmp.lt.s32.totalorder %s20_s10, %s20_s10 }
   0xa   :  { %p194_p3 = scmp.ne.s32.totalorder %s20_s10, %s193_s18  ;;  %p199_p5 = scmp.lt.s32.totalorder %s193_s18, %s193_s18 }
   0xc   :  { %p200_p6 = por %p199_p5, %p198_p4 }
   0xe   :  { %p201_p7 = pnand %p200_p6, %p194_p3 }
  0x10   :  { %204 = shalt.err (!%p201_p7)
}
  0x11   :  { %s256_s19 = smov 128   ;;  %s257_s20 = smov 8  }
  0x12   :  { %25 = dma.hbm_to_vmem [thread:$0]  %s325_s0, 256, %s20_s10, [#allocation5], %s256_s19, %s256_s19, %s257_s20  }
  0x13   :  { %s258_s23 = smov [#allocation7]   ;;  %s205_s27 = scalar_lea.hbm %s326_s1, 128 }
  0x14   :  { %s35_s24 = sshll.u32 %s258_s23, 4  ;;  %p206_p8 = scmp.ne.s32.totalorder %s326_s1, %s205_s27  ;;  %s36_s24 = int_to_ptr.vmem [resolvable:$true] %s35_s24 }
  0x15   :  { %p209_p9 = scmp.lt.u32.totalorder %s205_s27, %s326_s1 }
  0x17   :  { %p211_p10 = pnand %p209_p9, %p206_p8 }
  0x19   :  { %214 = shalt.err (!%p211_p10)
}
  0x1a   :  { %s215_s4 = scalar_lea.vmem %s36_s24, 128  ;;  %p220_p12 = scmp.lt.s32.totalorder %s36_s24, %s36_s24 }
  0x1b   :  { %p216_p11 = scmp.ne.s32.totalorder %s36_s24, %s215_s4  ;;  %p221_p13 = scmp.lt.s32.totalorder %s215_s4, %s215_s4 }
  0x1d   :  { %p222_p0 = por %p221_p13, %p220_p12 }
  0x1f   :  { %p223_p1 = pnand %p222_p0, %p216_p11 }
  0x21   :  { %226 = shalt.err (!%p223_p1)
}
  0x22   :  { %s259_s0 = smov 64   ;;  %s260_s5 = smov 4  }
  0x23   :  { %41 = dma.hbm_to_vmem [thread:$0]  %s326_s1, 128, %s36_s24, [#allocation8], %s259_s0, %s259_s0, %s260_s5  }
  0x24   :  { %249 = dma.done.wait [#allocation5], 256  }
  0x25   :  { %250 = vsyncadd [#allocation5], 4294967040 }
  0x26   :  { %251 = dma.done.wait [#allocation8], 128  }
  0x27   :  { %252 = vsyncadd [#allocation8], 4294967168  ;;  %v58_v0 = vld [vmem:[#allocation4] sm:$0xff]  ;;  %v59_v1 = vld [vmem:[#allocation4 + $0x8] sm:$0xff]  ;;  %s261_s1 = smov [#allocation9]  }
  0x28   :  { %v161_v2 = vld [vmem:[#allocation7] sm:$0xff]   ;;  %v64_v3 = vand.u32 2147483647, %v58_v0  ;;  %v65_v4 = vand.u32 2147483647, %v59_v1  ;;  %vm72_vm0 = vcmp.ge.f32.partialorder %v58_v0, 0.0 }
  0x29   :  { %v162_v5 = vunpack.c.l.bf16 %v161_v2  ;;  %v163_v6 = vunpack.c.h.bf16 %v161_v2  ;;  %vm73_vm1 = vcmp.ge.f32.partialorder %v59_v1, 0.0  ;;  %v82_v18 = vmax.f32 %v58_v0, 0.0  ;;  %s147_s8 = sshll.u32 %s261_s1, 4  ;;  %s148_s8 = int_to_ptr.vmem [resolvable:$true] %s147_s8 }
  0x2a   :  { %v66_v7 = vsub.f32 0.0, %v64_v3  ;;  %v67_v8 = vsub.f32 0.0, %v65_v4  ;;  %v83_v27 = vmax.f32 %v59_v1, 0.0  ;;  %s227_s9 = scalar_lea.vmem %s148_s8, 256  ;;  %p232_p3 = scmp.lt.s32.totalorder %s148_s8, %s148_s8 }
  0x2b   :  { %v131_v9 = vadd.f32 %v163_v6, %v162_v5  ;;  %v84_v21 = vmul.f32 %v162_v5, %v58_v0  ;;  %v85_v28 = vmul.f32 %v163_v6, %v59_v1  ;;  %v120_v47 = vmul.f32 -0.5, %v162_v5  ;;  %p228_p2 = scmp.ne.s32.totalorder %s148_s8, %s227_s9  ;;  %p233_p4 = scmp.lt.s32.totalorder %s227_s9, %s227_s9 }
  0x2c   :  { %v68_v10 = vmul.f32 1.442695, %v66_v7  ;;  %v70_v11 = vmul.f32 1.442695, %v67_v8  ;;  %v121_v50 = vmul.f32 -0.5, %v163_v6 }
  0x2d   :  { %141 = vst [vmem:[#allocation9 + $0x8] sm:$0xff] %v131_v9  ;;  %v86_v34 = vsub.f32 %v82_v18, %v84_v21  ;;  %v87_v41 = vsub.f32 %v83_v27, %v85_v28  ;;  %v122_v56 = vadd.f32 0.75, %v120_v47  ;;  %p234_p5 = por %p233_p4, %p232_p3 }
  0x2e   :  { %171 = vpow2.f32 %v68_v10  ;;  %v123_v58 = vadd.f32 0.75, %v121_v50 }
  0x2f   :  { %173 = vpow2.f32 %v70_v11  ;;  %p235_p6 = pnand %p234_p5, %p228_p2 }
  0x38   :  { %v172_v12 = vpop.eup %171 }
  0x39   :  { %v174_v13 = vpop.eup %173  ;;  %v76_v14 = vadd.f32 1.0, %v172_v12  ;;  %v91_v16 = vmul.f32 -0.5, %v172_v12  ;;  %v74_v20 = vsel %vm72_vm0, 1.0, %v172_v12  ;;  %v94_v22 = vand.u32 2147483647, %v172_v12 }
  0x3a   :  { %v77_v15 = vadd.f32 1.0, %v174_v13  ;;  %v100_v17 = vmul.f32 -0.5, %v174_v13  ;;  %v75_v24 = vsel %vm73_vm1, 1.0, %v174_v13  ;;  %v103_v25 = vand.u32 2147483647, %v174_v13 }
  0x3b   :  { %175 = vrcp.f32 %v76_v14  ;;  %v92_v19 = vadd.f32 1.0, %v91_v16  ;;  %vm304_vm2 = vcmp.lt.f32.partialorder %v94_v22, 0.0004427343 }
  0x3c   :  { %177 = vrcp.f32 %v77_v15  ;;  %v101_v23 = vadd.f32 1.0, %v100_v17  ;;  %vm104_vm3 = vcmp.lt.f32.partialorder %v103_v25, 0.0004427343 }
  0x3d   :  { %179 = vlog2.f32 %v76_v14  ;;  %v93_v31 = vmul.f32 %v172_v12, %v92_v19 }
  0x3e   :  { %181 = vlog2.f32 %v77_v15  ;;  %v102_v36 = vmul.f32 %v174_v13, %v101_v23 }
  0x45   :  { %v176_v26 = vpop.eup %175 }
  0x46   :  { %v178_v29 = vpop.eup %177  ;;  %v79_v30 = vmul.f32 %v176_v26, %v74_v20 }
  0x47   :  { %v180_v32 = vpop.eup %179  ;;  %v81_v33 = vmul.f32 %v178_v29, %v75_v24 }
  0x48   :  { %v182_v37 = vpop.eup %181  ;;  %v90_v38 = vmul.f32 0.6931472, %v180_v32  ;;  %v108_v39 = vadd.f32 %v162_v5, %v79_v30  ;;  %v110_v40 = vmul.f32 %v162_v5, %v79_v30 }
  0x49   :  { %v99_v42 = vmul.f32 0.6931472, %v182_v37  ;;  %v109_v43 = vadd.f32 %v163_v6, %v81_v33  ;;  %v111_v44 = vmul.f32 %v163_v6, %v81_v33 }
  0x4a   :  { %v96_v45 = vsel %vm304_vm2, %v93_v31, %v90_v38  ;;  %v112_v46 = vmul.f32 2.0, %v110_v40 }
  0x4b   :  { %v105_v48 = vsel %vm104_vm3, %v102_v36, %v99_v42  ;;  %v113_v49 = vmul.f32 2.0, %v111_v44  ;;  %v106_v51 = vadd.f32 %v96_v45, %v86_v34 }
  0x4c   :  { %v114_v52 = vsub.f32 %v108_v39, %v112_v46  ;;  %v107_v53 = vadd.f32 %v105_v48, %v87_v41 }
  0x4d   :  { %v115_v54 = vsub.f32 %v109_v43, %v113_v49 }
  0x4e   :  { %v116_v55 = vmul.f32 %v114_v52, %v114_v52 }
  0x4f   :  { %v117_v57 = vmul.f32 %v115_v54, %v115_v54 }
  0x50   :  { %v118_v59 = vmul.f32 %v116_v55, %v106_v51 }
  0x51   :  { %v119_v60 = vmul.f32 %v117_v57, %v107_v53 }
  0x52   :  { %v124_v61 = vmul.f32 %v122_v56, %v118_v59 }
  0x53   :  { %v125_v62 = vmul.f32 %v123_v58, %v119_v60 }
  0x55   :  { %v127_v63 = vadd.f32 %v125_v62, %v124_v61 }
  0x57   :  { %138 = vst [vmem:[#allocation9] sm:$0xff] %v127_v63 }
  0x58   :  { %238 = shalt.err (!%p235_p6)
}
  0x59   :  { %s239_s12 = scalar_lea.hbm %s327_s2, 256 }
  0x5a   :  { %p240_p7 = scmp.ne.s32.totalorder %s327_s2, %s239_s12  ;;  %p243_p8 = scmp.lt.u32.totalorder %s239_s12, %s327_s2 }
  0x5c   :  { %p245_p9 = pnand %p243_p8, %p240_p7 }
  0x5e   :  { %248 = shalt.err (!%p245_p9)
}
  0x5f   :  { %153 = dma.vmem_to_hbm [thread:$0]  %s148_s8, 256, %s327_s2, [#allocation6], %s256_s19, %s256_s19, %s257_s20  }
  0x60   :  { %253 = dma.done.wait [#allocation6], 256  }
  0x61   :  { %254 = vsyncadd [#allocation6], 4294967040 }
  0x62   :  { %157 = vsyncpa [#allocation5], 1 }
  0x63   :  { %158 = vsyncpa [#allocation8], 1 }
  0x64   :  { %159 = vsyncpa [#allocation6], 1 }

</bundles_post_ra>
